<compile_context>
chip_gen: v5e
topology: v5e:2x2
jax: 0.10.0
libtpu: 0.0.40
codegen_flags: <defaults>
</compile_context>

<pallas_src>
import functools

import jax
import jax.numpy as jnp
import numpy as np
from jax.experimental import pallas as pl
from jax.experimental.pallas import tpu as pltpu


def _round_up(x, m):
    return ((x + m - 1) // m) * m


def _mlp_autoencoder_kernel(x_ref, w1_ref, b1_ref, w2_ref, b2_ref, o_ref):
    # x_ref: (TM, D) bf16, w1_ref: (D, H) bf16, b1_ref: (1, H) f32,
    # w2_ref: (H, D) bf16, b2_ref: (1, D) f32, o_ref: (TM, D) f32.
    x = x_ref[...]
    # Layer 1: bf16 operands on the MXU, f32 accumulation; bias/ReLU in f32.
    h = jnp.dot(x, w1_ref[...], preferred_element_type=jnp.float32) + b1_ref[...]
    h = jnp.maximum(h, 0.0)
    # Layer 2: hidden cast back to bf16 for the MXU, f32 accumulation.
    out = (
        jnp.dot(h.astype(jnp.bfloat16), w2_ref[...], preferred_element_type=jnp.float32)
        + b2_ref[...]
    )
    o_ref[...] = out.astype(o_ref.dtype)


def model_autoencoder_forward(x, params):
    """Forward pass of ModelAutoencoder with flatten=True.

    x: (B, C, H, W) float32 (NCHW, same as PyTorch).
    params: dict with w1 (D,H), b1 (H,), w2 (H,D), b2 (D,).
    """
    orig_shape = x.shape
    B = int(orig_shape[0])
    D = int(np.prod(orig_shape[1:]))
    x_flat = x.reshape(B, D)  # same order as torch.flatten(x, start_dim=1)

    # bf16 matmul operands, f32 biases.
    w1 = params["w1"].astype(jnp.bfloat16)
    w2 = params["w2"].astype(jnp.bfloat16)
    H = int(w1.shape[1])
    b1 = params["b1"].astype(jnp.float32).reshape(1, H)
    b2 = params["b2"].astype(jnp.float32).reshape(1, D)

    # Batch tiling: pad to a sublane multiple; cap the tile at 256 rows so one
    # grid step fills the v6e/v7x 256-wide MXU (two pushes on v5e's 128 MXU).
    b_pad8 = _round_up(max(B, 1), 8)
    if b_pad8 <= 256:
        tile_m = b_pad8
        b_padded = b_pad8
    else:
        tile_m = 256
        b_padded = _round_up(B, tile_m)

    x_bf16 = x_flat.astype(jnp.bfloat16)
    if b_padded != B:
        x_bf16 = jnp.pad(x_bf16, ((0, b_padded - B), (0, 0)))

    grid = (b_padded // tile_m,)

    flops = 4 * b_padded * D * H  # two (M,D)x(D,H)-sized GEMMs
    bytes_accessed = (
        b_padded * D * 2            # x (bf16)
        + D * H * 2 + H * D * 2     # w1, w2 (bf16)
        + H * 4 + D * 4             # biases (f32)
        + b_padded * D * 4          # output (f32)
    )

    out_padded = pl.pallas_call(
        _mlp_autoencoder_kernel,
        out_shape=jax.ShapeDtypeStruct((b_padded, D), jnp.float32),
        grid_spec=pltpu.PrefetchScalarGridSpec(
            num_scalar_prefetch=0,
            grid=grid,
            in_specs=[
                pl.BlockSpec((tile_m, D), lambda i: (i, 0)),  # x tile per step
                pl.BlockSpec((D, H), lambda i: (0, 0)),       # w1: VMEM-resident
                pl.BlockSpec((1, H), lambda i: (0, 0)),       # b1: VMEM-resident
                pl.BlockSpec((H, D), lambda i: (0, 0)),       # w2: VMEM-resident
                pl.BlockSpec((1, D), lambda i: (0, 0)),       # b2: VMEM-resident
            ],
            out_specs=pl.BlockSpec((tile_m, D), lambda i: (i, 0)),
        ),
        compiler_params=pltpu.CompilerParams(
            dimension_semantics=("parallel",),  # v7x: split batch across TCs
        ),
        cost_estimate=pl.CostEstimate(
            flops=flops, transcendentals=0, bytes_accessed=bytes_accessed
        ),
    )(x_bf16, w1, b1, w2, b2)

    out_flat = out_padded[:B]
    return out_flat.reshape(orig_shape)  # x.reshape(orig_shape)


def init_params(key, D, H, dtype=jnp.float32):
    """Deterministic nn.Linear-style init (uniform +-1/sqrt(fan_in))."""
    k1, k2, k3, k4 = jax.random.split(key, 4)
    s1 = 1.0 / np.sqrt(D)
    s2 = 1.0 / np.sqrt(H)
    return {
        "w1": jax.random.uniform(k1, (D, H), dtype, minval=-s1, maxval=s1),
        "b1": jax.random.uniform(k2, (H,), dtype, minval=-s1, maxval=s1),
        "w2": jax.random.uniform(k3, (H, D), dtype, minval=-s2, maxval=s2),
        "b2": jax.random.uniform(k4, (D,), dtype, minval=-s2, maxval=s2),
    }


if __name__ == "__main__":
    key = jax.random.PRNGKey(0)
    k_x, k_p = jax.random.split(key)

    # input_output_shape = (4, 16, 16)  ->  flat_shape = (1024,)
    B, C, Hs, Ws = 2, 4, 16, 16
    D = C * Hs * Ws          # 1024 (lane-dense, multiple of 128)
    HIDDEN = 128             # hidden width of the MLP model_cls

    x = jax.random.normal(k_x, (B, C, Hs, Ws), dtype=jnp.float32)
    params = init_params(k_p, D, HIDDEN)

    out = model_autoencoder_forward(x, params)
    out = jax.block_until_ready(out)

    assert out.shape == x.shape, (out.shape, x.shape)

    # Reference in plain JAX using the same bf16-operand / f32-accumulate math.
    x_flat = x.reshape(B, D).astype(jnp.bfloat16)
    w1_bf = params["w1"].astype(jnp.bfloat16)
    w2_bf = params["w2"].astype(jnp.bfloat16)
    h_ref = jnp.maximum(
        jnp.dot(x_flat, w1_bf, preferred_element_type=jnp.float32) + params["b1"], 0.0
    )
    ref = (
        jnp.dot(h_ref.astype(jnp.bfloat16), w2_bf, preferred_element_type=jnp.float32)
        + params["b2"]
    ).reshape(x.shape)
    np.testing.assert_allclose(np.asarray(out), np.asarray(ref), rtol=1e-2, atol=1e-2)

    print("KERNEL_OK")
</pallas_src>

<mosaic_0001>
module attributes {stable_mosaic.version = 11 : i64} {
  func.func @_mlp_autoencoder_kernel(%arg0: i32, %arg1: memref<8x1024xbf16, #tpu.memory_space<vmem>>, %arg2: memref<1024x128xbf16, #tpu.memory_space<vmem>>, %arg3: memref<1x128xf32, #tpu.memory_space<vmem>>, %arg4: memref<128x1024xbf16, #tpu.memory_space<vmem>>, %arg5: memref<1x1024xf32, #tpu.memory_space<vmem>>, %arg6: memref<8x1024xf32, #tpu.memory_space<vmem>>) attributes {dimension_semantics = [#tpu.dimension_semantics<parallel>], iteration_bounds = array<i64: 1>, scalar_prefetch = 0 : i64, scratch_operands = 0 : i64, tpu.core_type = #tpu.core_type<tc>, window_params = [{transform_indices = @transform_0, window_bounds = array<i64: 8, 1024>}, {pipeline_mode = #tpu.pipeline_mode<synchronous>, transform_indices = @transform_1, window_bounds = array<i64: 1024, 128>}, {pipeline_mode = #tpu.pipeline_mode<synchronous>, transform_indices = @transform_2, window_bounds = array<i64: 1, 128>}, {pipeline_mode = #tpu.pipeline_mode<synchronous>, transform_indices = @transform_3, window_bounds = array<i64: 128, 1024>}, {pipeline_mode = #tpu.pipeline_mode<synchronous>, transform_indices = @transform_4, window_bounds = array<i64: 1, 1024>}, {transform_indices = @transform_5, window_bounds = array<i64: 8, 1024>}]} {
    %c0 = arith.constant 0 : index
    %c0_0 = arith.constant 0 : index
    %0 = vector.load %arg1[%c0, %c0_0] : memref<8x1024xbf16, #tpu.memory_space<vmem>>, vector<8x1024xbf16>
    %c0_1 = arith.constant 0 : index
    %c0_2 = arith.constant 0 : index
    %1 = vector.load %arg2[%c0_1, %c0_2] : memref<1024x128xbf16, #tpu.memory_space<vmem>>, vector<1024x128xbf16>
    %cst = arith.constant dense<0.000000e+00> : vector<8x128xf32>
    %2 = tpu.matmul %0, %1, %cst {dimension_numbers = #tpu.dot_dimension_numbers<[1], [0], [0], [1], [0, 0, 1, 1], [], []>} : vector<8x1024xbf16>, vector<1024x128xbf16>, vector<8x128xf32> -> vector<8x128xf32>
    %c0_3 = arith.constant 0 : index
    %c0_4 = arith.constant 0 : index
    %3 = vector.load %arg3[%c0_3, %c0_4] : memref<1x128xf32, #tpu.memory_space<vmem>>, vector<1x128xf32>
    %4 = vector.broadcast %3 : vector<1x128xf32> to vector<8x128xf32>
    %5 = arith.addf %2, %4 : vector<8x128xf32>
    %cst_5 = arith.constant 0.000000e+00 : f32
    %6 = vector.broadcast %cst_5 : f32 to vector<8x128xf32>
    %7 = arith.maximumf %5, %6 : vector<8x128xf32>
    %8 = arith.truncf %7 : vector<8x128xf32> to vector<8x128xbf16>
    %c0_6 = arith.constant 0 : index
    %c0_7 = arith.constant 0 : index
    %9 = vector.load %arg4[%c0_6, %c0_7] : memref<128x1024xbf16, #tpu.memory_space<vmem>>, vector<128x1024xbf16>
    %cst_8 = arith.constant dense<0.000000e+00> : vector<8x1024xf32>
    %10 = tpu.matmul %8, %9, %cst_8 {dimension_numbers = #tpu.dot_dimension_numbers<[1], [0], [0], [1], [0, 0, 1, 1], [], []>} : vector<8x128xbf16>, vector<128x1024xbf16>, vector<8x1024xf32> -> vector<8x1024xf32>
    %c0_9 = arith.constant 0 : index
    %c0_10 = arith.constant 0 : index
    %11 = vector.load %arg5[%c0_9, %c0_10] : memref<1x1024xf32, #tpu.memory_space<vmem>>, vector<1x1024xf32>
    %12 = vector.broadcast %11 : vector<1x1024xf32> to vector<8x1024xf32>
    %13 = arith.addf %10, %12 : vector<8x1024xf32>
    %c0_11 = arith.constant 0 : index
    %c0_12 = arith.constant 0 : index
    %14 = vector.load %arg6[%c0_11, %c0_12] : memref<8x1024xf32, #tpu.memory_space<vmem>>, vector<8x1024xf32>
    tpu.vector_store %arg6[%c0_11, %c0_12], %13 {strides = array<i32>} : memref<8x1024xf32, #tpu.memory_space<vmem>>, vector<8x1024xf32>,
    return
  }
  func.func @transform_0(%arg0: i32) -> (i32, i32) {
    %c0_i32 = arith.constant 0 : i32
    %c0_i32_0 = arith.constant 0 : i32
    return %arg0, %c0_i32 : i32, i32
  }
  func.func @transform_1(%arg0: i32) -> (i32, i32) {
    %c0_i32 = arith.constant 0 : i32
    %c0_i32_0 = arith.constant 0 : i32
    %c0_i32_1 = arith.constant 0 : i32
    return %c0_i32, %c0_i32_0 : i32, i32
  }
  func.func @transform_2(%arg0: i32) -> (i32, i32) {
    %c0_i32 = arith.constant 0 : i32
    %c0_i32_0 = arith.constant 0 : i32
    %c0_i32_1 = arith.constant 0 : i32
    return %c0_i32, %c0_i32_0 : i32, i32
  }
  func.func @transform_3(%arg0: i32) -> (i32, i32) {
    %c0_i32 = arith.constant 0 : i32
    %c0_i32_0 = arith.constant 0 : i32
    %c0_i32_1 = arith.constant 0 : i32
    return %c0_i32, %c0_i32_0 : i32, i32
  }
  func.func @transform_4(%arg0: i32) -> (i32, i32) {
    %c0_i32 = arith.constant 0 : i32
    %c0_i32_0 = arith.constant 0 : i32
    %c0_i32_1 = arith.constant 0 : i32
    return %c0_i32, %c0_i32_0 : i32, i32
  }
  func.func @transform_5(%arg0: i32) -> (i32, i32) {
    %c0_i32 = arith.constant 0 : i32
    %c0_i32_0 = arith.constant 0 : i32
    return %arg0, %c0_i32 : i32, i32
  }
}

</mosaic_0001>

<bundles_post_ra>
// kernel: tpu_custom_call.1
= control target key start
LH: loop header
LB: loop body
LE: loop exit
PB: predicated region body
PF: predicated region fallthrough
CT: control target
= control target key end

     0   :  { %10 = vsyncpa [#allocation3], 0  ;;  %s2114_s0 = inlined_call_operand.hbm [shape: bf16[8,1024], index: 0, kind: input, shape index: {}]   ;;  %s2115_s1 = inlined_call_operand.hbm [shape: bf16[1024,128], index: 1, kind: input, shape index: {}]   ;;  %s2116_s2 = inlined_call_operand.vmem [shape: f32[1,128], index: 2, kind: input, shape index: {}]   ;;  %s2117_s3 = inlined_call_operand.hbm [shape: bf16[128,1024], index: 3, kind: input, shape index: {}]   ;;  %s2118_s4 = inlined_call_operand.hbm [shape: f32[1,1024], index: 4, kind: input, shape index: {}]   ;;  %s2119_s5 = inlined_call_operand.hbm [shape: f32[8,1024], index: 5, kind: output, shape index: {}]  }
   0x1   :  { %11 = vsyncpa [#allocation6], 0 }
   0x2   :  { %12 = vsyncpa [#allocation9], 0  ;;  %s29_s20 = sshll.u32 %s2115_s1, 4  ;;  %s30_s20 = int_to_ptr.hbm [resolvable:$true] %s29_s20 }
   0x3   :  { %13 = vsyncpa [#allocation4], 0  ;;  %s2045_s21 = smov [#allocation5]   ;;  %s19_s25 = sshll.u32 %s2114_s0, 4  ;;  %s20_s25 = int_to_ptr.hbm [resolvable:$true] %s19_s25 }
   0x4   :  { %s31_s22 = sshll.u32 %s2045_s21, 4  ;;  %s2046_s26 = smov 64   ;;  %s32_s22 = int_to_ptr.vmem [resolvable:$true] %s31_s22 }
   0x5   :  { %s2047_s27 = smov 4   ;;  %s2048_s28 = smov [#allocation2]  }
   0x6   :  { %37 = dma.hbm_to_vmem [thread:$0]  %s30_s20, 8192, %s32_s22, [#allocation6], %s2046_s26, %s2046_s26, %s2047_s27  }
   0x7   :  { %s21_s29 = sshll.u32 %s2048_s28, 4  ;;  %s44_s7 = sshll.u32 %s2117_s3, 4  ;;  %s22_s29 = int_to_ptr.vmem [resolvable:$true] %s21_s29  ;;  %s45_s7 = int_to_ptr.hbm [resolvable:$true] %s44_s7 }
   0x8   :  { %24 = dma.hbm_to_vmem [thread:$0]  %s20_s25, 512, %s22_s29, [#allocation3]  }
   0x9   :  { %s2049_s1 = smov [#allocation7]   ;;  %s58_s0 = sshll.u32 %s2118_s4, 4  ;;  %s59_s0 = int_to_ptr.hbm [resolvable:$true] %s58_s0 }
   0xa   :  { %s46_s8 = sshll.u32 %s2049_s1, 4  ;;  %s2050_s11 = smov 512   ;;  %s47_s8 = int_to_ptr.vmem [resolvable:$true] %s46_s8 }
   0xb   :  { %s2051_s12 = smov 32   ;;  %s2052_s13 = smov [#allocation8]  }
   0xc   :  { %52 = dma.hbm_to_vmem [thread:$0]  %s45_s7, 8192, %s47_s8, [#allocation6], %s2050_s11, %s2050_s11, %s2051_s12  }
   0xd   :  { %s60_s14 = sshll.u32 %s2052_s13, 4  ;;  %s61_s14 = int_to_ptr.vmem [resolvable:$true] %s60_s14 }
   0xe   :  { %63 = dma.hbm_to_vmem [thread:$0]  %s59_s0, 128, %s61_s14, [#allocation9]  }
   0xf   :  { %2037 = dma.done.wait [#allocation3], 512  }
  0x10   :  { %2038 = vsyncadd [#allocation3], 4294966784 }
  0x11   :  { %2039 = dma.done.wait [#allocation6], 16384  }
  0x12   :  { %2040 = vsyncadd [#allocation6], 4294950912 }
  0x13   :  { %2041 = dma.done.wait [#allocation9], 128  }
  0x14   :  { %2042 = vsyncadd [#allocation9], 4294967168  ;;  %v1786_v0 = vld [vmem:[#allocation5 + $0x38] sm:$0xff]  ;;  %v1785_v4 = vld [vmem:[#allocation5 + $0x30] sm:$0xff]  ;;  %s1255_s18 = sshll.u32 %s2119_s5, 4  ;;  %s1256_s18 = int_to_ptr.hbm [resolvable:$true] %s1255_s18 }
  0x15   :  { %v1794_v1 = vld [vmem:[#allocation5 + $0x78] sm:$0xff]  ;;  %628 = vmatpush.bf16.msra.mxu0 %v1786_v0  ;;  %v1793_v5 = vld [vmem:[#allocation5 + $0x70] sm:$0xff]  ;;  %v1784_v8 = vld [vmem:[#allocation5 + $0x28] sm:$0xff] }
  0x16   :  { %v1802_v2 = vld [vmem:[#allocation5 + $0xb8] sm:$0xff]  ;;  %641 = vmatpush.bf16.msra.mxu1 %v1794_v1  ;;  %v1801_v6 = vld [vmem:[#allocation5 + $0xb0] sm:$0xff]  ;;  %v1792_v9 = vld [vmem:[#allocation5 + $0x68] sm:$0xff] }
  0x17   :  { %v1810_v3 = vld [vmem:[#allocation5 + $0xf8] sm:$0xff]  ;;  %654 = vmatpush.bf16.msra.mxu2 %v1802_v2  ;;  %v1809_v7 = vld [vmem:[#allocation5 + $0xf0] sm:$0xff]  ;;  %v1800_v10 = vld [vmem:[#allocation5 + $0xa8] sm:$0xff] }
  0x18   :  { %667 = vmatpush.bf16.msra.mxu3 %v1810_v3  ;;  %v1808_v11 = vld [vmem:[#allocation5 + $0xe8] sm:$0xff]  ;;  %v1783_v12 = vld [vmem:[#allocation5 + $0x20] sm:$0xff]  ;;  %v1782_v16 = vld [vmem:[#allocation5 + $0x18] sm:$0xff] }
  0x19   :  { %629 = vmatpush.bf16.msra.mxu0 %v1785_v4  ;;  %v1791_v13 = vld [vmem:[#allocation5 + $0x60] sm:$0xff]  ;;  %v1790_v17 = vld [vmem:[#allocation5 + $0x58] sm:$0xff]  ;;  %v1781_v20 = vld [vmem:[#allocation5 + $0x10] sm:$0xff] }
  0x1a   :  { %642 = vmatpush.bf16.msra.mxu1 %v1793_v5  ;;  %v1799_v14 = vld [vmem:[#allocation5 + $0xa0] sm:$0xff]  ;;  %v1798_v18 = vld [vmem:[#allocation5 + $0x98] sm:$0xff]  ;;  %v1789_v21 = vld [vmem:[#allocation5 + $0x50] sm:$0xff] }
  0x1b   :  { %655 = vmatpush.bf16.msra.mxu2 %v1801_v6  ;;  %v1807_v15 = vld [vmem:[#allocation5 + $0xe0] sm:$0xff]  ;;  %v1806_v19 = vld [vmem:[#allocation5 + $0xd8] sm:$0xff]  ;;  %v1797_v22 = vld [vmem:[#allocation5 + $0x90] sm:$0xff] }
  0x1c   :  { %668 = vmatpush.bf16.msra.mxu3 %v1809_v7  ;;  %v1805_v23 = vld [vmem:[#allocation5 + $0xd0] sm:$0xff]  ;;  %v1780_v24 = vld [vmem:[#allocation5 + $0x8] sm:$0xff]  ;;  %v80_v29 = vld [vmem:[#allocation2] sm:$0xff] }
  0x1d   :  { %630 = vmatpush.bf16.msra.mxu0 %v1784_v8  ;;  %v1788_v25 = vld [vmem:[#allocation5 + $0x48] sm:$0xff]  ;;  %v1779_v30 = vld [vmem:[#allocation5] sm:$0xff]  ;;  %v220_v33 = vunpack.c.l.b16 %v80_v29  ;;  %v221_v37 = vunpack.c.h.b16 %v80_v29  ;;  %v1818_v38 = vld [vmem:[#allocation5 + $0x138] sm:$0xff] }
  0x1e   :  { %643 = vmatpush.bf16.msra.mxu1 %v1792_v9  ;;  %v1796_v26 = vld [vmem:[#allocation5 + $0x88] sm:$0xff]  ;;  %v1787_v31 = vld [vmem:[#allocation5 + $0x40] sm:$0xff]  ;;  %v1826_v39 = vld [vmem:[#allocation5 + $0x178] sm:$0xff] }
  0x1f   :  { %656 = vmatpush.bf16.msra.mxu2 %v1800_v10  ;;  %v1804_v27 = vld [vmem:[#allocation5 + $0xc8] sm:$0xff]  ;;  %v1795_v34 = vld [vmem:[#allocation5 + $0x80] sm:$0xff]  ;;  %v1834_v40 = vld [vmem:[#allocation5 + $0x1b8] sm:$0xff]  ;;  %v228_v43 = vpack.c.b16 %v220_v33, %v220_v33  ;;  %v229_v45 = vpack.c.b16 %v221_v37, %v221_v37 }
  0x20   :  { %669 = vmatpush.bf16.msra.mxu3 %v1808_v11  ;;  %v81_v28 = vld [vmem:[#allocation2 + $0x8] sm:$0xff]  ;;  %v1803_v35 = vld [vmem:[#allocation5 + $0xc0] sm:$0xff]  ;;  %v1842_v41 = vld [vmem:[#allocation5 + $0x1f8] sm:$0xff] }
  0x21   :  { %631 = vmatpush.bf16.msra.mxu0 %v1783_v12  ;;  %v222_v32 = vunpack.c.l.b16 %v81_v28  ;;  %v223_v36 = vunpack.c.h.b16 %v81_v28  ;;  %v1817_v46 = vld [vmem:[#allocation5 + $0x130] sm:$0xff]  ;;  %v1816_v50 = vld [vmem:[#allocation5 + $0x128] sm:$0xff]  ;;  %v1815_v54 = vld [vmem:[#allocation5 + $0x120] sm:$0xff] }
  0x22   :  { %644 = vmatpush.bf16.msra.mxu1 %v1791_v13  ;;  %v1825_v47 = vld [vmem:[#allocation5 + $0x170] sm:$0xff]  ;;  %v1824_v51 = vld [vmem:[#allocation5 + $0x168] sm:$0xff]  ;;  %v1823_v55 = vld [vmem:[#allocation5 + $0x160] sm:$0xff] }
  0x23   :  { %657 = vmatpush.bf16.msra.mxu2 %v1799_v14  ;;  %v230_v42 = vpack.c.b16 %v222_v32, %v222_v32  ;;  %v231_v44 = vpack.c.b16 %v223_v36, %v223_v36  ;;  %v1833_v48 = vld [vmem:[#allocation5 + $0x1b0] sm:$0xff]  ;;  %v1832_v52 = vld [vmem:[#allocation5 + $0x1a8] sm:$0xff]  ;;  %v1831_v56 = vld [vmem:[#allocation5 + $0x1a0] sm:$0xff] }
  0x24   :  { %670 = vmatpush.bf16.msra.mxu3 %v1807_v15  ;;  %v1841_v49 = vld [vmem:[#allocation5 + $0x1f0] sm:$0xff]  ;;  %v1840_v53 = vld [vmem:[#allocation5 + $0x1e8] sm:$0xff]  ;;  %v1839_v57 = vld [vmem:[#allocation5 + $0x1e0] sm:$0xff] }
  0x25   :  { %632 = vmatpush.bf16.msra.mxu0 %v1782_v16  ;;  %v1814_v58 = vld [vmem:[#allocation5 + $0x118] sm:$0xff]  ;;  %v1813_v62 = vld [vmem:[#allocation5 + $0x110] sm:$0xff]  ;;  %v1812_v2 = vld [vmem:[#allocation5 + $0x108] sm:$0xff] }
  0x26   :  { %645 = vmatpush.bf16.msra.mxu1 %v1790_v17  ;;  %v1822_v59 = vld [vmem:[#allocation5 + $0x158] sm:$0xff]  ;;  %v1821_v63 = vld [vmem:[#allocation5 + $0x150] sm:$0xff]  ;;  %v1820_v3 = vld [vmem:[#allocation5 + $0x148] sm:$0xff] }
  0x27   :  { %658 = vmatpush.bf16.msra.mxu2 %v1798_v18  ;;  %v1830_v60 = vld [vmem:[#allocation5 + $0x198] sm:$0xff]  ;;  %v1829_v0 = vld [vmem:[#allocation5 + $0x190] sm:$0xff]  ;;  %v1828_v5 = vld [vmem:[#allocation5 + $0x188] sm:$0xff] }
  0x28   :  { %671 = vmatpush.bf16.msra.mxu3 %v1806_v19  ;;  %v1838_v61 = vld [vmem:[#allocation5 + $0x1d8] sm:$0xff]  ;;  %v1837_v1 = vld [vmem:[#allocation5 + $0x1d0] sm:$0xff]  ;;  %v1836_v6 = vld [vmem:[#allocation5 + $0x1c8] sm:$0xff] }
  0x29   :  { %633 = vmatpush.bf16.msra.mxu0 %v1781_v20  ;;  %v82_v4 = vld [vmem:[#allocation2 + $0x10] sm:$0xff]  ;;  %v83_v7 = vld [vmem:[#allocation2 + $0x18] sm:$0xff]  ;;  %v1749_v8 = vld [vmem:[#allocation7 + $0x1c0] sm:$0xf] }
  0x2a   :  { %646 = vmatpush.bf16.msra.mxu1 %v1789_v21  ;;  %v224_v9 = vunpack.c.l.b16 %v82_v4  ;;  %v225_v10 = vunpack.c.h.b16 %v82_v4  ;;  %v1903_v11 = vld [vmem:[#allocation7 + $0x1dc] sm:$0xf0]  ;;  %v1899_v12 = vld [vmem:[#allocation7 + $0x1c4] sm:$0xf]  ;;  %v226_v17 = vunpack.c.l.b16 %v83_v7  ;;  %v227_v18 = vunpack.c.h.b16 %v83_v7  ;;  %v1757_v20 = vld [vmem:[#allocation7 + $0x1c8] sm:$0xf] }
  0x2b   :  { %659 = vmatpush.bf16.msra.mxu2 %v1797_v22  ;;  %v1751_v13 = vld [vmem:[#allocation7 + $0x1e0] sm:$0xf0]  ;;  %v1904_v21 = vld [vmem:[#allocation7 + $0x1e4] sm:$0xf0]  ;;  %v1750_v22 = vor.u32 %v1903_v11, %v1749_v8  ;;  %v1895_v29 = vld [vmem:[#allocation7 + $0x19c] sm:$0xf0] }
  0x2c   :  { %672 = vmatpush.bf16.msra.mxu3 %v1805_v23  ;;  %v1811_v14 = vld [vmem:[#allocation5 + $0x100] sm:$0xff]  ;;  %v1754_v23 = vor.u32 %v1899_v12, %v1751_v13  ;;  %v233_v28 = vpack.c.b16 %v225_v10, %v225_v10  ;;  %v234_v32 = vpack.c.b16 %v226_v17, %v226_v17  ;;  %v235_v33 = vpack.c.b16 %v227_v18, %v227_v18  ;;  %v1725_v36 = vld [vmem:[#allocation7 + $0x188] sm:$0xf]  ;;  %v1868_v12 = vld [vmem:[#allocation7 + $0xcc] sm:$0xf] }
  0x2d   :  { %634 = vmatpush.bf16.msra.mxu0 %v1780_v24  ;;  %v1819_v15 = vld [vmem:[#allocation5 + $0x140] sm:$0xff]  ;;  %v1900_v24 = vld [vmem:[#allocation7 + $0x1cc] sm:$0xf]  ;;  %v1629_v10 = vld [vmem:[#allocation7 + $0xc8] sm:$0xf] }
  0x2e   :  { %647 = vmatpush.bf16.msra.mxu1 %v1788_v25  ;;  %v1827_v16 = vld [vmem:[#allocation5 + $0x180] sm:$0xff]  ;;  %v1759_v25 = vld [vmem:[#allocation7 + $0x1e8] sm:$0xf0]  ;;  %v1872_v11 = vld [vmem:[#allocation7 + $0xe4] sm:$0xf0] }
  0x2f   :  { %660 = vmatpush.bf16.msra.mxu2 %v1796_v26  ;;  %v1835_v19 = vld [vmem:[#allocation5 + $0x1c0] sm:$0xff]  ;;  %v1630_v13 = vor.u32 %v1872_v11, %v1629_v10  ;;  %v1894_v11 = vld [vmem:[#allocation7 + $0x19c] sm:$0xf] }
  0x30   :  { %673 = vmatpush.bf16.msra.mxu3 %v1804_v27  ;;  %v1717_v26 = vld [vmem:[#allocation7 + $0x180] sm:$0xf]  ;;  %v232_v27 = vpack.c.b16 %v224_v9, %v224_v9  ;;  %v1623_v7 = vld [vmem:[#allocation7 + $0xe0] sm:$0xf0] }
  0x31   :  { %635 = vmatpush.bf16.msra.mxu0 %v1779_v30  ;;  %v1891_v30 = vld [vmem:[#allocation7 + $0x184] sm:$0xf]  ;;  %v1718_v37 = vor.u32 %v1895_v29, %v1717_v26  ;;  %v1863_v17 = vld [vmem:[#allocation7 + $0x9c] sm:$0xf0]  ;;  %v1599_v26 = vld [vmem:[#allocation7 + $0xa8] sm:$0xf0] }
  0x32   :  { %648 = vmatpush.bf16.msra.mxu1 %v1787_v31  ;;  %v1719_v31 = vld [vmem:[#allocation7 + $0x1a0] sm:$0xf0]  ;;  %v1855_v29 = vld [vmem:[#allocation7 + $0x5c] sm:$0xf0] }
  0x33   :  { %661 = vmatpush.bf16.msra.mxu2 %v1795_v34  ;;  %v1758_v34 = vor.u32 %v1904_v21, %v1757_v20  ;;  %v1859_v18 = vld [vmem:[#allocation7 + $0x84] sm:$0xf]  ;;  %v1597_v21 = vld [vmem:[#allocation7 + $0x88] sm:$0xf] }
  0x34   :  { %674 = vmatpush.bf16.msra.mxu3 %v1803_v35  ;;  %636 = vmatmul.bf16.vlgmr.msra.gmra.mxu0 %v228_v43  ;;  %v1762_v35 = vor.u32 %v1900_v24, %v1759_v25  ;;  %v1591_v20 = vld [vmem:[#allocation7 + $0xa0] sm:$0xf0]  ;;  %v1860_v25 = vld [vmem:[#allocation7 + $0x8c] sm:$0xf] }
  0x35   :  { %680 = vmatpush.bf16.msrb.mxu0 %v1818_v38  ;;  %649 = vmatmul.bf16.vlgmr.msra.gmra.mxu1 %v229_v45  ;;  %v1722_v38 = vor.u32 %v1891_v30, %v1719_v31  ;;  %v1887_v45 = vld [vmem:[#allocation7 + $0x15c] sm:$0xf0]  ;;  %v1851_v30 = vld [vmem:[#allocation7 + $0x44] sm:$0xf] }
  0x36   :  { %693 = vmatpush.bf16.msrb.mxu1 %v1826_v39  ;;  %662 = vmatmul.bf16.vlgmr.msra.gmra.mxu2 %v230_v42  ;;  %v1896_v39 = vld [vmem:[#allocation7 + $0x1a4] sm:$0xf0]  ;;  %v1559_v31 = vld [vmem:[#allocation7 + $0x60] sm:$0xf0] }
  0x37   :  { %706 = vmatpush.bf16.msrb.mxu2 %v1834_v40  ;;  %675 = vmatmul.bf16.vlgmr.msra.gmra.mxu3 %v231_v44  ;;  %v1892_v40 = vld [vmem:[#allocation7 + $0x18c] sm:$0xf]  ;;  %v1726_v42 = vor.u32 %v1896_v39, %v1725_v36  ;;  %v1685_v44 = vld [vmem:[#allocation7 + $0x140] sm:$0xf]  ;;  %v1562_v36 = vor.u32 %v1851_v30, %v1559_v31  ;;  %v1877_v30 = vld [vmem:[#allocation7 + $0x114] sm:$0xf] }
  0x38   :  { %719 = vmatpush.bf16.msrb.mxu3 %v1842_v41  ;;  %v1727_v41 = vld [vmem:[#allocation7 + $0x1a8] sm:$0xf0]  ;;  %v1525_v39 = vld [vmem:[#allocation7] sm:$0xf] }
  0x39   :  { %681 = vmatpush.bf16.msrb.mxu0 %v1817_v46  ;;  %v1730_v43 = vor.u32 %v1892_v40, %v1727_v41  ;;  %v1883_v46 = vld [vmem:[#allocation7 + $0x144] sm:$0xf]  ;;  %v1847_v40 = vld [vmem:[#allocation7 + $0x1c] sm:$0xf0] }
  0x3a   :  { %694 = vmatpush.bf16.msrb.mxu1 %v1825_v47  ;;  %v1686_v47 = vor.u32 %v1887_v45, %v1685_v44  ;;  %v1533_v44 = vld [vmem:[#allocation7 + $0x8] sm:$0xf] }
  0x3b   :  { %707 = vmatpush.bf16.msrb.mxu2 %v1833_v48  ;;  %v1687_v48 = vld [vmem:[#allocation7 + $0x160] sm:$0xf0]  ;;  %v1848_v45 = vld [vmem:[#allocation7 + $0x24] sm:$0xf0] }
  0x3c   :  { %720 = vmatpush.bf16.msrb.mxu3 %v1841_v49  ;;  %v1693_v49 = vld [vmem:[#allocation7 + $0x148] sm:$0xf] }
  0x3d   :  { %682 = vmatpush.bf16.msrb.mxu0 %v1816_v50  ;;  %v1888_v50 = vld [vmem:[#allocation7 + $0x164] sm:$0xf0] }
  0x3e   :  { %695 = vmatpush.bf16.msrb.mxu1 %v1824_v51  ;;  %v1690_v51 = vor.u32 %v1883_v46, %v1687_v48  ;;  %v1844_v46 = vld [vmem:[#allocation7 + $0xc] sm:$0xf]  ;;  %v1526_v48 = vor.u32 %v1847_v40, %v1525_v39  ;;  %v1878_v39 = vld [vmem:[#allocation7 + $0x11c] sm:$0xf] }
  0x3f   :  { %708 = vmatpush.bf16.msrb.mxu2 %v1832_v52  ;;  %v1694_v52 = vor.u32 %v1888_v50, %v1693_v49  ;;  %v1534_v50 = vor.u32 %v1848_v45, %v1533_v44  ;;  %v1679_v40 = vld [vmem:[#allocation7 + $0x138] sm:$0xf0]  ;;  %v1873_v44 = vld [vmem:[#allocation7 + $0xec] sm:$0xf0]  ;;  %v1869_v45 = vld [vmem:[#allocation7 + $0xd4] sm:$0xf] }
  0x40   :  { %721 = vmatpush.bf16.msrb.mxu3 %v1840_v53  ;;  %v1884_v53 = vld [vmem:[#allocation7 + $0x14c] sm:$0xf] }
  0x41   :  { %683 = vmatpush.bf16.msrb.mxu0 %v1815_v54  ;;  %v1695_v54 = vld [vmem:[#allocation7 + $0x168] sm:$0xf0] }
  0x42   :  { %696 = vmatpush.bf16.msrb.mxu1 %v1823_v55  ;;  %v1698_v55 = vor.u32 %v1884_v53, %v1695_v54  ;;  %v1905_v53 = vld [vmem:[#allocation7 + $0x1ec] sm:$0xf0]  ;;  %v1901_v54 = vld [vmem:[#allocation7 + $0x1d4] sm:$0xf] }
  0x43   :  { %709 = vmatpush.bf16.msrb.mxu2 %v1831_v56  ;;  %v1653_v56 = vld [vmem:[#allocation7 + $0x100] sm:$0xf] }
  0x44   :  { %722 = vmatpush.bf16.msrb.mxu3 %v1839_v57  ;;  %v1879_v57 = vld [vmem:[#allocation7 + $0x11c] sm:$0xf0] }
  0x45   :  { %684 = vmatpush.bf16.msrb.mxu0 %v1814_v58  ;;  %v1875_v58 = vld [vmem:[#allocation7 + $0x104] sm:$0xf] }
  0x46   :  { %697 = vmatpush.bf16.msrb.mxu1 %v1822_v59  ;;  %v1654_v59 = vor.u32 %v1879_v57, %v1653_v56  ;;  %v1767_v56 = vld [vmem:[#allocation7 + $0x1f0] sm:$0xf0]  ;;  %v1773_v57 = vld [vmem:[#allocation7 + $0x1d8] sm:$0xf] }
  0x47   :  { %710 = vmatpush.bf16.msrb.mxu2 %v1830_v60  ;;  %v1655_v60 = vld [vmem:[#allocation7 + $0x120] sm:$0xf0] }
  0x48   :  { %723 = vmatpush.bf16.msrb.mxu3 %v1838_v61  ;;  %v1661_v61 = vld [vmem:[#allocation7 + $0x108] sm:$0xf] }
  0x49   :  { %685 = vmatpush.bf16.msrb.mxu0 %v1813_v62  ;;  %v1880_v62 = vld [vmem:[#allocation7 + $0x124] sm:$0xf0] }
  0x4a   :  { %698 = vmatpush.bf16.msrb.mxu1 %v1821_v63  ;;  %v1658_v63 = vor.u32 %v1875_v58, %v1655_v60  ;;  %v1906_v58 = vld [vmem:[#allocation7 + $0x1f4] sm:$0xf0] }
  0x4b   :  { %711 = vmatpush.bf16.msrb.mxu2 %v1829_v0  ;;  %v1662_v0 = vor.u32 %v1880_v62, %v1661_v61  ;;  %v1774_v60 = vor.u32 %v1906_v58, %v1773_v57  ;;  %v1902_v61 = vld [vmem:[#allocation7 + $0x1dc] sm:$0xf]  ;;  %v1865_v58 = vld [vmem:[#allocation7 + $0xac] sm:$0xf0] }
  0x4c   :  { %724 = vmatpush.bf16.msrb.mxu3 %v1837_v1  ;;  %v1876_v1 = vld [vmem:[#allocation7 + $0x10c] sm:$0xf]  ;;  %v1775_v62 = vld [vmem:[#allocation7 + $0x1f8] sm:$0xf0] }
  0x4d   :  { %686 = vmatpush.bf16.msrb.mxu0 %v1812_v2  ;;  %v1663_v2 = vld [vmem:[#allocation7 + $0x128] sm:$0xf0] }
  0x4e   :  { %699 = vmatpush.bf16.msrb.mxu1 %v1820_v3  ;;  %v1621_v3 = vld [vmem:[#allocation7 + $0xc0] sm:$0xf]  ;;  %v1666_v4 = vor.u32 %v1876_v1, %v1663_v2  ;;  %v1897_v1 = vld [vmem:[#allocation7 + $0x1ac] sm:$0xf0]  ;;  %v1893_v2 = vld [vmem:[#allocation7 + $0x194] sm:$0xf] }
  0x4f   :  { %712 = vmatpush.bf16.msrb.mxu2 %v1828_v5  ;;  %v1871_v5 = vld [vmem:[#allocation7 + $0xdc] sm:$0xf0] }
  0x50   :  { %725 = vmatpush.bf16.msrb.mxu3 %v1836_v6  ;;  %v1867_v6 = vld [vmem:[#allocation7 + $0xc4] sm:$0xf]  ;;  %v1622_v8 = vor.u32 %v1871_v5, %v1621_v3  ;;  %v1735_v5 = vld [vmem:[#allocation7 + $0x1b0] sm:$0xf0] }
  0x51   :  { %687 = vmatpush.bf16.msrb.mxu0 %v1811_v14  ;;  %v1626_v9 = vor.u32 %v1867_v6, %v1623_v7  ;;  %v1631_v14 = vld [vmem:[#allocation7 + $0xe8] sm:$0xf0]  ;;  %v1741_v6 = vld [vmem:[#allocation7 + $0x198] sm:$0xf] }
  0x52   :  { %700 = vmatpush.bf16.msrb.mxu1 %v1819_v15  ;;  %v1634_v15 = vor.u32 %v1868_v12, %v1631_v14  ;;  %v1898_v7 = vld [vmem:[#allocation7 + $0x1b4] sm:$0xf0]  ;;  %v1743_v12 = vld [vmem:[#allocation7 + $0x1b8] sm:$0xf0]  ;;  %v1701_v14 = vld [vmem:[#allocation7 + $0x150] sm:$0xf] }
  0x53   :  { %713 = vmatpush.bf16.msrb.mxu2 %v1827_v16  ;;  %v1589_v16 = vld [vmem:[#allocation7 + $0x80] sm:$0xf]  ;;  %v1742_v10 = vor.u32 %v1898_v7, %v1741_v6  ;;  %v1573_v6 = vld [vmem:[#allocation7 + $0x50] sm:$0xf] }
  0x54   :  { %726 = vmatpush.bf16.msrb.mxu3 %v1835_v19  ;;  %688 = vmatmul.bf16.vlgmr.msrb.gmra.mxu0 %v232_v27  ;;  %v1590_v19 = vor.u32 %v1863_v17, %v1589_v16  ;;  %v1557_v27 = vld [vmem:[#allocation7 + $0x40] sm:$0xf]  ;;  %v1885_v16 = vld [vmem:[#allocation7 + $0x154] sm:$0xf]  ;;  %v1857_v7 = vld [vmem:[#allocation7 + $0x6c] sm:$0xf0] }
  0x55   :  { %1136 = vmatpush.bf16.msra.mxu0 %v1750_v22  ;;  %701 = vmatmul.bf16.vlgmr.msrb.gmra.mxu1 %v233_v28  ;;  %v1864_v22 = vld [vmem:[#allocation7 + $0xa4] sm:$0xf0]  ;;  %v1602_v28 = vor.u32 %v1860_v25, %v1599_v26 }
  0x56   :  { %1149 = vmatpush.bf16.msra.mxu1 %v1754_v23  ;;  %714 = vmatmul.bf16.vlgmr.msrb.gmra.mxu2 %v234_v32  ;;  %v1594_v23 = vor.u32 %v1859_v18, %v1591_v20  ;;  %v1598_v24 = vor.u32 %v1864_v22, %v1597_v21  ;;  %v1558_v32 = vor.u32 %v1855_v29, %v1557_v27  ;;  %v1703_v18 = vld [vmem:[#allocation7 + $0x170] sm:$0xf0]  ;;  %v1890_v20 = vld [vmem:[#allocation7 + $0x174] sm:$0xf0]  ;;  %v1881_v29 = vld [vmem:[#allocation7 + $0x12c] sm:$0xf0] }
  0x57   :  { %727 = vmatmul.bf16.vlgmr.msrb.gmra.mxu3 %v235_v33  ;;  %1162 = vmatpush.bf16.msra.mxu2 %v1758_v34  ;;  %v1565_v33 = vld [vmem:[#allocation7 + $0x48] sm:$0xf]  ;;  %v1706_v21 = vor.u32 %v1885_v16, %v1703_v18  ;;  %v1583_v16 = vld [vmem:[#allocation7 + $0x78] sm:$0xf0] }
  0x58   :  { %1175 = vmatpush.bf16.msra.mxu3 %v1762_v35  ;;  %v1856_v34 = vld [vmem:[#allocation7 + $0x64] sm:$0xf0]  ;;  %v1852_v35 = vld [vmem:[#allocation7 + $0x4c] sm:$0xf] }
  0x59   :  { %1137 = vmatpush.bf16.msra.mxu0 %v1718_v37  ;;  %v1566_v37 = vor.u32 %v1856_v34, %v1565_v33  ;;  %v1671_v33 = vld [vmem:[#allocation7 + $0x130] sm:$0xf0]  ;;  %v1677_v34 = vld [vmem:[#allocation7 + $0x118] sm:$0xf] }
  0x5a   :  { %1150 = vmatpush.bf16.msra.mxu1 %v1722_v38  ;;  %v1567_v38 = vld [vmem:[#allocation7 + $0x68] sm:$0xf0] }
  0x5b   :  { %1163 = vmatpush.bf16.msra.mxu2 %v1726_v42  ;;  %v1570_v41 = vor.u32 %v1852_v35, %v1567_v38  ;;  %v1843_v42 = vld [vmem:[#allocation7 + $0x4] sm:$0xf]  ;;  %v1882_v35 = vld [vmem:[#allocation7 + $0x134] sm:$0xf0] }
  0x5c   :  { %1176 = vmatpush.bf16.msra.mxu3 %v1730_v43  ;;  %v1527_v43 = vld [vmem:[#allocation7 + $0x20] sm:$0xf0]  ;;  %v1678_v38 = vor.u32 %v1882_v35, %v1677_v34 }
  0x5d   :  { %1138 = vmatpush.bf16.msra.mxu0 %v1686_v47  ;;  %v1535_v47 = vld [vmem:[#allocation7 + $0x28] sm:$0xf0]  ;;  %v1530_v49 = vor.u32 %v1843_v42, %v1527_v43  ;;  %v1916_v42 = vld [vmem:[%s2116_s2] ss:$0 sm:$0xff]  ;;  %v1637_v43 = vld [vmem:[#allocation7 + $0xd0] sm:$0xf] }
  0x5e   :  { %1151 = vmatpush.bf16.msra.mxu1 %v1690_v51  ;;  %v1538_v51 = vor.u32 %v1844_v46, %v1535_v47  ;;  %v1638_v46 = vor.u32 %v1873_v44, %v1637_v43  ;;  %v1639_v47 = vld [vmem:[#allocation7 + $0xf0] sm:$0xf0]  ;;  %s2053_s2 = smov [#allocation10]  }
  0x5f   :  { %1164 = vmatpush.bf16.msra.mxu2 %v1694_v52  ;;  %v1765_v52 = vld [vmem:[#allocation7 + $0x1d0] sm:$0xf]  ;;  %s1253_s15 = sshll.u32 %s2053_s2, 4  ;;  %s1254_s15 = int_to_ptr.vmem [resolvable:$true] %s1253_s15 }
  0x60   :  { %1177 = vmatpush.bf16.msra.mxu3 %v1698_v55  ;;  %v1766_v55 = vor.u32 %v1905_v53, %v1765_v52  ;;  %v1870_v53 = vld [vmem:[#allocation7 + $0xdc] sm:$0xf] }
  0x61   :  { %1139 = vmatpush.bf16.msra.mxu0 %v1654_v59  ;;  %v1770_v59 = vor.u32 %v1901_v54, %v1767_v56  ;;  %v1647_v54 = vld [vmem:[#allocation7 + $0xf8] sm:$0xf0] }
  0x62   :  { %1152 = vmatpush.bf16.msra.mxu1 %v1658_v63  ;;  %v1778_v63 = vor.u32 %v1902_v61, %v1775_v62  ;;  %v1650_v57 = vor.u32 %v1870_v53, %v1647_v54 }
  0x63   :  { %1165 = vmatpush.bf16.msra.mxu2 %v1662_v0  ;;  %v1733_v0 = vld [vmem:[#allocation7 + $0x190] sm:$0xf] }
  0x64   :  { %1178 = vmatpush.bf16.msra.mxu3 %v1666_v4  ;;  %v1734_v4 = vor.u32 %v1897_v1, %v1733_v0  ;;  %v1866_v0 = vld [vmem:[#allocation7 + $0xb4] sm:$0xf0]  ;;  %v1862_v1 = vld [vmem:[#allocation7 + $0x9c] sm:$0xf] }
  0x65   :  { %1140 = vmatpush.bf16.msra.mxu0 %v1622_v8 }
  0x66   :  { %1153 = vmatpush.bf16.msra.mxu1 %v1626_v9  ;;  %v1738_v9 = vor.u32 %v1893_v2, %v1735_v5  ;;  %v1615_v5 = vld [vmem:[#allocation7 + $0xb8] sm:$0xf0] }
  0x67   :  { %1166 = vmatpush.bf16.msra.mxu2 %v1630_v13  ;;  %v1746_v13 = vor.u32 %v1894_v11, %v1743_v12  ;;  %v1575_v11 = vld [vmem:[#allocation7 + $0x70] sm:$0xf0]  ;;  %v1581_v12 = vld [vmem:[#allocation7 + $0x58] sm:$0xf] }
  0x68   :  { %1179 = vmatpush.bf16.msra.mxu3 %v1634_v15  ;;  %v1889_v15 = vld [vmem:[#allocation7 + $0x16c] sm:$0xf0] }
  0x69   :  { %1141 = vmatpush.bf16.msra.mxu0 %v1590_v19  ;;  %v1702_v17 = vor.u32 %v1889_v15, %v1701_v14  ;;  %v1709_v19 = vld [vmem:[#allocation7 + $0x158] sm:$0xf]  ;;  %v1854_v15 = vld [vmem:[#allocation7 + $0x5c] sm:$0xf] }
  0x6a   :  { %1154 = vmatpush.bf16.msra.mxu1 %v1594_v23  ;;  %v1710_v22 = vor.u32 %v1890_v20, %v1709_v19  ;;  %v1886_v23 = vld [vmem:[#allocation7 + $0x15c] sm:$0xf]  ;;  %v1858_v14 = vld [vmem:[#allocation7 + $0x74] sm:$0xf0]  ;;  %v1541_v19 = vld [vmem:[#allocation7 + $0x10] sm:$0xf] }
  0x6b   :  { %1167 = vmatpush.bf16.msra.mxu2 %v1598_v24  ;;  %v1711_v24 = vld [vmem:[#allocation7 + $0x178] sm:$0xf0]  ;;  %v1582_v18 = vor.u32 %v1858_v14, %v1581_v12  ;;  %v1845_v20 = vld [vmem:[#allocation7 + $0x14] sm:$0xf] }
  0x6c   :  { %1180 = vmatpush.bf16.msra.mxu3 %v1602_v28  ;;  %v1714_v26 = vor.u32 %v1886_v23, %v1711_v24  ;;  %v1669_v28 = vld [vmem:[#allocation7 + $0x110] sm:$0xf]  ;;  %v1543_v23 = vld [vmem:[#allocation7 + $0x30] sm:$0xf0]  ;;  %v1549_v24 = vld [vmem:[#allocation7 + $0x18] sm:$0xf] }
  0x6d   :  { %1142 = vmatpush.bf16.msra.mxu0 %v1558_v32  ;;  %v1670_v32 = vor.u32 %v1881_v29, %v1669_v28  ;;  %v1846_v28 = vld [vmem:[#allocation7 + $0x1c] sm:$0xf] }
  0x6e   :  { %1155 = vmatpush.bf16.msra.mxu1 %v1562_v36  ;;  %v1551_v29 = vld [vmem:[#allocation7 + $0x38] sm:$0xf0] }
  0x6f   :  { %1168 = vmatpush.bf16.msra.mxu2 %v1566_v37  ;;  %v1674_v37 = vor.u32 %v1877_v30, %v1671_v33  ;;  %v1554_v34 = vor.u32 %v1846_v28, %v1551_v29 }
  0x70   :  { %1181 = vmatpush.bf16.msra.mxu3 %v1570_v41  ;;  %v1682_v41 = vor.u32 %v1878_v39, %v1679_v40 }
  0x71   :  { %1143 = vmatpush.bf16.msra.mxu0 %v1526_v48  ;;  %v1645_v48 = vld [vmem:[#allocation7 + $0xd8] sm:$0xf] }
  0x72   :  { %1156 = vmatpush.bf16.msra.mxu1 %v1530_v49  ;;  %v1874_v49 = vld [vmem:[#allocation7 + $0xf4] sm:$0xf0] }
  0x73   :  { %1169 = vmatpush.bf16.msra.mxu2 %v1534_v50  ;;  %v1646_v52 = vor.u32 %v1874_v49, %v1645_v48 }
  0x74   :  { %1182 = vmatpush.bf16.msra.mxu3 %v1538_v51  ;;  %v1642_v51 = vor.u32 %v1869_v45, %v1639_v47 }
  0x75   :  { %1188 = vmatpush.bf16.msrb.mxu0 %v1766_v55  ;;  %v1605_v55 = vld [vmem:[#allocation7 + $0x90] sm:$0xf] }
  0x76   :  { %1201 = vmatpush.bf16.msrb.mxu1 %v1770_v59  ;;  %v1861_v59 = vld [vmem:[#allocation7 + $0x94] sm:$0xf]  ;;  %v1606_v61 = vor.u32 %v1865_v58, %v1605_v55 }
  0x77   :  { %1214 = vmatpush.bf16.msrb.mxu2 %v1774_v60  ;;  %v1607_v60 = vld [vmem:[#allocation7 + $0xb0] sm:$0xf0] }
  0x78   :  { %1227 = vmatpush.bf16.msrb.mxu3 %v1778_v63  ;;  %v1610_v62 = vor.u32 %v1861_v59, %v1607_v60  ;;  %v1613_v63 = vld [vmem:[#allocation7 + $0x98] sm:$0xf] }
  0x79   :  { %1189 = vmatpush.bf16.msrb.mxu0 %v1734_v4  ;;  %v1614_v4 = vor.u32 %v1866_v0, %v1613_v63 }
  0x7a   :  { %1202 = vmatpush.bf16.msrb.mxu1 %v1738_v9  ;;  %v1618_v9 = vor.u32 %v1862_v1, %v1615_v5 }
  0x7b   :  { %1215 = vmatpush.bf16.msrb.mxu2 %v1742_v10  ;;  %v1853_v10 = vld [vmem:[#allocation7 + $0x54] sm:$0xf] }
  0x7c   :  { %1228 = vmatpush.bf16.msrb.mxu3 %v1746_v13  ;;  %v1574_v13 = vor.u32 %v1857_v7, %v1573_v6 }
  0x7d   :  { %1190 = vmatpush.bf16.msrb.mxu0 %v1702_v17  ;;  %v1578_v17 = vor.u32 %v1853_v10, %v1575_v11 }
  0x7e   :  { %1203 = vmatpush.bf16.msrb.mxu1 %v1706_v21 }
  0x7f   :  { %1216 = vmatpush.bf16.msrb.mxu2 %v1710_v22  ;;  %v1586_v22 = vor.u32 %v1854_v15, %v1583_v16 }
  0x80   :  { %1229 = vmatpush.bf16.msrb.mxu3 %v1714_v26  ;;  %v1850_v26 = vld [vmem:[#allocation7 + $0x34] sm:$0xf0] }
  0x81   :  { %1191 = vmatpush.bf16.msrb.mxu0 %v1670_v32  ;;  %v1550_v32 = vor.u32 %v1850_v26, %v1549_v24 }
  0x82   :  { %1204 = vmatpush.bf16.msrb.mxu1 %v1674_v37 }
  0x83   :  { %1217 = vmatpush.bf16.msrb.mxu2 %v1678_v38 }
  0x84   :  { %1230 = vmatpush.bf16.msrb.mxu3 %v1682_v41 }
  0x85   :  { %1192 = vmatpush.bf16.msrb.mxu0 %v1638_v46 }
  0x86   :  { %1205 = vmatpush.bf16.msrb.mxu1 %v1642_v51 }
  0x87   :  { %1218 = vmatpush.bf16.msrb.mxu2 %v1646_v52 }
  0x88   :  { %1231 = vmatpush.bf16.msrb.mxu3 %v1650_v57 }
  0x89   :  { %1193 = vmatpush.bf16.msrb.mxu0 %v1606_v61 }
  0x8a   :  { %1206 = vmatpush.bf16.msrb.mxu1 %v1610_v62 }
  0x8b   :  { %1219 = vmatpush.bf16.msrb.mxu2 %v1614_v4 }
  0x8c   :  { %1232 = vmatpush.bf16.msrb.mxu3 %v1618_v9 }
  0x8d   :  { %1194 = vmatpush.bf16.msrb.mxu0 %v1574_v13 }
  0x8e   :  { %1207 = vmatpush.bf16.msrb.mxu1 %v1578_v17 }
  0x8f   :  { %1220 = vmatpush.bf16.msrb.mxu2 %v1582_v18 }
  0x90   :  { %1233 = vmatpush.bf16.msrb.mxu3 %v1586_v22 }
  0x93   :  { %1221 = vmatpush.bf16.msrb.mxu2 %v1550_v32 }
  0x94   :  { %1234 = vmatpush.bf16.msrb.mxu3 %v1554_v34 }
  0xb1   :  { %v2096_v3 = vpop.f32.mrf.mxu0 }
  0xb2   :  { %v2098_v8 = vpop.f32.mrf.mxu1  ;;  %v638_v2 = vadd.f32 %v1916_v42, %v2096_v3  ;;  %v1849_v3 = vld [vmem:[#allocation7 + $0x2c] sm:$0xf0] }
  0xb3   :  { %v1542_v30 = vor.u32 %v1849_v3, %v1541_v19 }
  0xb4   :  { %v651_v21 = vadd.f32 %v2098_v8, %v638_v2 }
  0xb5   :  { %1195 = vmatpush.bf16.msrb.mxu0 %v1542_v30 }
  0xb9   :  { %v2100_v25 = vpop.f32.mrf.mxu2  ;;  %v639_v31 = vpop.f32.mrf.mxu0 }
  0xba   :  { %v2102_v27 = vpop.f32.mrf.mxu3  ;;  %v652_v36 = vpop.f32.mrf.mxu1  ;;  %v1546_v31 = vor.u32 %v1845_v20, %v1543_v23  ;;  %v664_v33 = vadd.f32 %v2100_v25, %v651_v21 }
  0xbc   :  { %1208 = vmatpush.bf16.msrb.mxu1 %v1546_v31  ;;  %v677_v8 = vadd.f32 %v2102_v27, %v664_v33  ;;  %v798_v27 = vld [vmem:[#allocation8] sm:$0xff] }
  0xbd   :  { %v800_v48 = vperm.slane %v798_v27, 0  ;;  %v801_v49 = vperm.slane %v798_v27, 1  ;;  %v802_v54 = vperm.slane %v798_v27, 2  ;;  %v803_v55 = vperm.slane %v798_v27, 3 }
  0xbe   :  { %v804_v62 = vperm.slane %v798_v27, 4  ;;  %v805_v63 = vperm.slane %v798_v27, 5  ;;  %v806_v7 = vperm.slane %v798_v27, 6  ;;  %v807_v9 = vperm.slane %v798_v27, 7 }
  0xc1   :  { %v665_v50 = vpop.f32.mrf.mxu2 }
  0xc2   :  { %v678_v56 = vpop.f32.mrf.mxu3 }
  0xd1   :  { %v689_v35 = vpop.f32.mrf.mxu0 }
  0xd2   :  { %v702_v36 = vpop.f32.mrf.mxu1  ;;  %v690_v37 = vadd.f32 %v689_v35, %v677_v8 }
  0xd4   :  { %v703_v38 = vadd.f32 %v702_v36, %v690_v37 }
  0xd9   :  { %v715_v39 = vpop.f32.mrf.mxu2  ;;  %v691_v42 = vpop.f32.mrf.mxu0 }
  0xda   :  { %v728_v40 = vpop.f32.mrf.mxu3  ;;  %v716_v41 = vadd.f32 %v715_v39, %v703_v38  ;;  %v704_v43 = vpop.f32.mrf.mxu1 }
  0xdc   :  { %v729_v44 = vadd.f32 %v728_v40, %v716_v41 }
  0xde   :  { %v732_v45 = vmax.f32 %v729_v44, 0.0 }
  0xe0   :  { %v733_v25 = vpack.c.bf16 %v732_v45, %v732_v45 }
  0xe1   :  { %v717_v46 = vpop.f32.mrf.mxu2 }
  0xe2   :  { %v730_v47 = vpop.f32.mrf.mxu3  ;;  %1144 = vmatmul.bf16.vlgmr.msra.gmra.mxu0 %v733_v25  ;;  %1157 = vmatmul.bf16.vlgmr.msra.gmra.mxu1 %v733_v25 }
  0xe3   :  { %1170 = vmatmul.bf16.vlgmr.msra.gmra.mxu2 %v733_v25  ;;  %1183 = vmatmul.bf16.vlgmr.msra.gmra.mxu3 %v733_v25 }
  0xf2   :  { %1196 = vmatmul.bf16.vlgmr.msrb.gmra.mxu0 %v733_v25  ;;  %1209 = vmatmul.bf16.vlgmr.msrb.gmra.mxu1 %v733_v25 }
  0xf3   :  { %1222 = vmatmul.bf16.vlgmr.msrb.gmra.mxu2 %v733_v25  ;;  %1235 = vmatmul.bf16.vlgmr.msrb.gmra.mxu3 %v733_v25 }
 0x15f   :  { %v1145_v50 = vpop.f32.mrf.mxu0  ;;  %v1158_v51 = vpop.f32.mrf.mxu1 }
 0x160   :  { %v1146_v52 = vadd.f32 %v1145_v50, %v800_v48  ;;  %v1159_v53 = vadd.f32 %v1158_v51, %v801_v49 }
 0x162   :  { %1240 = vst [vmem:[#allocation10] sm:$0xff] %v1146_v52 }
 0x163   :  { %1241 = vst [vmem:[#allocation10 + $0x8] sm:$0xff] %v1159_v53 }
 0x166   :  { %v1171_v56 = vpop.f32.mrf.mxu2  ;;  %v1184_v57 = vpop.f32.mrf.mxu3 }
 0x167   :  { %v1172_v58 = vadd.f32 %v1171_v56, %v802_v54  ;;  %v1185_v59 = vadd.f32 %v1184_v57, %v803_v55  ;;  %v1147_v60 = vpop.f32.mrf.mxu0  ;;  %v1160_v61 = vpop.f32.mrf.mxu1 }
 0x169   :  { %1242 = vst [vmem:[#allocation10 + $0x10] sm:$0xff] %v1172_v58 }
 0x16a   :  { %1243 = vst [vmem:[#allocation10 + $0x18] sm:$0xff] %v1185_v59 }
 0x16e   :  { %v1173_v0 = vpop.f32.mrf.mxu2  ;;  %v1186_v1 = vpop.f32.mrf.mxu3 }
 0x16f   :  { %v1197_v2 = vpop.f32.mrf.mxu0  ;;  %v1210_v4 = vpop.f32.mrf.mxu1 }
 0x170   :  { %v1198_v5 = vadd.f32 %v1197_v2, %v804_v62  ;;  %v1211_v6 = vadd.f32 %v1210_v4, %v805_v63 }
 0x172   :  { %1244 = vst [vmem:[#allocation10 + $0x20] sm:$0xff] %v1198_v5 }
 0x173   :  { %1245 = vst [vmem:[#allocation10 + $0x28] sm:$0xff] %v1211_v6 }
 0x176   :  { %v1223_v10 = vpop.f32.mrf.mxu2  ;;  %v1236_v11 = vpop.f32.mrf.mxu3 }
 0x177   :  { %v1224_v12 = vadd.f32 %v1223_v10, %v806_v7  ;;  %v1237_v13 = vadd.f32 %v1236_v11, %v807_v9  ;;  %v1199_v14 = vpop.f32.mrf.mxu0  ;;  %v1212_v15 = vpop.f32.mrf.mxu1 }
 0x179   :  { %1246 = vst [vmem:[#allocation10 + $0x30] sm:$0xff] %v1224_v12 }
 0x17a   :  { %1247 = vst [vmem:[#allocation10 + $0x38] sm:$0xff] %v1237_v13 }
 0x17b   :  { %1258 = dma.vmem_to_hbm [thread:$0]  %s1254_s15, 1024, %s1256_s18, [#allocation4]  }
 0x17e   :  { %v1225_v16 = vpop.f32.mrf.mxu2  ;;  %v1238_v17 = vpop.f32.mrf.mxu3 }
 0x17f   :  { %2043 = dma.done.wait [#allocation4], 1024  }
 0x180   :  { %2044 = vsyncadd [#allocation4], 4294966272 }
 0x181   :  { %1263 = vsyncpa [#allocation3], 1 }
 0x182   :  { %1264 = vsyncpa [#allocation6], 1 }
 0x183   :  { %1265 = vsyncpa [#allocation9], 1 }
 0x184   :  { %1266 = vsyncpa [#allocation4], 1 }

</bundles_post_ra>
